<compile_context>
chip_gen: v7x
topology: tpu7x:2x2x1
jax: 0.10.0
libtpu: 0.0.40
codegen_flags: <defaults>
</compile_context>

<pallas_src>
import functools

import jax
import jax.numpy as jnp
from jax.experimental import pallas as pl
from jax.experimental.pallas import tpu as pltpu

_LANE = 128
_NEG_BIG = -1.0e30  # finite "-inf" for padded action logits (avoids NaN in x - max)


def _round_up(x: int, m: int) -> int:
    return ((x + m - 1) // m) * m


def _actor_kernel(x_ref, w1_ref, b1_ref, w2_ref, b2_ref, w3_ref, b3_ref, pi_ref):
    """Fused fc1 -> relu -> fc2 -> relu -> pi -> softmax for one batch tile.

    All feature dims are pre-padded to multiples of 128 (lane width), so every
    activation / store is full-lane. All math in f32.
    """
    x = x_ref[...]

    # fc1 + ReLU
    h1 = jnp.dot(x, w1_ref[...], preferred_element_type=jnp.float32) + b1_ref[...]
    h1 = jnp.maximum(h1, 0.0)

    # fc2 + ReLU
    h2 = jnp.dot(h1, w2_ref[...], preferred_element_type=jnp.float32) + b2_ref[...]
    h2 = jnp.maximum(h2, 0.0)

    # pi (logits); padded action columns carry bias ~ -1e30 -> softmax ~ 0
    logits = jnp.dot(h2, w3_ref[...], preferred_element_type=jnp.float32) + b3_ref[...]

    # numerically-stable softmax over the action dim (torch dim=1), exact divide
    m = jnp.max(logits, axis=-1, keepdims=True)
    e = jnp.exp(logits - m)
    denom = jnp.sum(e, axis=-1, keepdims=True)
    pi_ref[...] = (e / denom).astype(pi_ref.dtype)


def prepare_actor_params(w1, b1, w2, b2, w3, b3):
    """One-time layout prep (do NOT call per forward):

    pads fc1/fc2/n_actions up to multiples of 128. Zero padding is exact through
    ReLU; padded pi-bias entries are -1e30 so padded actions get ~0 probability.
    """
    d_in, f1 = w1.shape
    f2 = w2.shape[1]
    na = w3.shape[1]
    f1p = _round_up(f1, _LANE)
    f2p = _round_up(f2, _LANE)
    nap = _round_up(na, _LANE)

    w1p = jnp.zeros((d_in, f1p), jnp.float32).at[:, :f1].set(w1)
    b1p = jnp.zeros((1, f1p), jnp.float32).at[:, :f1].set(b1.reshape(1, -1))
    w2p = jnp.zeros((f1p, f2p), jnp.float32).at[:f1, :f2].set(w2)
    b2p = jnp.zeros((1, f2p), jnp.float32).at[:, :f2].set(b2.reshape(1, -1))
    w3p = jnp.zeros((f2p, nap), jnp.float32).at[:f2, :na].set(w3)
    b3p = jnp.full((1, nap), _NEG_BIG, jnp.float32).at[:, :na].set(b3.reshape(1, -1))
    return w1p, b1p, w2p, b2p, w3p, b3p


@functools.partial(jax.jit, static_argnames=("n_actions", "block_b"))
def actor_forward(state, w1p, b1p, w2p, b2p, w3p, b3p, *, n_actions, block_b=None):
    """Pallas-fused ActorNetwork.forward.

    state: (B, input_dims) float32
    w*p/b*p: lane-padded params from `prepare_actor_params`
    returns: (B, n_actions) float32 softmax probabilities.
    """
    B, d_in = state.shape
    f1p = w1p.shape[1]
    f2p = w2p.shape[1]
    nap = w3p.shape[1]

    if block_b is None:
        # Single grid step for typical RL batches (single-TC chips: grid is a
        # serial loop, extra steps are pure overhead; VMEM is not a constraint).
        # Very large batches tile by 1024 rows; ragged last tile is OOB-masked.
        block_b = B if B <= 4096 else 1024
    grid = (pl.cdiv(B, block_b),)

    # Constant index_map -> weights/biases fetched once, resident in VMEM.
    full2 = lambda shape: pl.BlockSpec(shape, lambda i: (0, 0))

    out = pl.pallas_call(
        _actor_kernel,
        out_shape=jax.ShapeDtypeStruct((B, nap), jnp.float32),
        grid_spec=pltpu.PrefetchScalarGridSpec(
            num_scalar_prefetch=0,
            grid=grid,
            in_specs=[
                pl.BlockSpec((block_b, d_in), lambda i: (i, 0)),  # state tile
                full2((d_in, f1p)),                               # W1
                full2((1, f1p)),                                  # b1
                full2((f1p, f2p)),                                # W2
                full2((1, f2p)),                                  # b2
                full2((f2p, nap)),                                # W3
                full2((1, nap)),                                  # b3
            ],
            out_specs=pl.BlockSpec((block_b, nap), lambda i: (i, 0)),
        ),
        compiler_params=pltpu.CompilerParams(
            dimension_semantics=("arbitrary",)),
    )(state, w1p, b1p, w2p, b2p, w3p, b3p)

    # Only the action-dim slice remains (tiny (B, n_actions) copy).
    return out[:, :n_actions]


def init_actor_params(key, input_dims, fc1_dims, fc2_dims, n_actions):
    """Deterministic init matching torch.nn.Linear default:
    U(-1/sqrt(fan_in), 1/sqrt(fan_in)) for both weight and bias.
    Weights are stored transposed vs torch (in_features, out_features)."""
    keys = jax.random.split(key, 6)

    def linear(kw, kb, fan_in, fan_out):
        bound = 1.0 / jnp.sqrt(jnp.float32(fan_in))
        w = jax.random.uniform(kw, (fan_in, fan_out), jnp.float32,
                               minval=-bound, maxval=bound)
        b = jax.random.uniform(kb, (1, fan_out), jnp.float32,
                               minval=-bound, maxval=bound)
        return w, b

    w1, b1 = linear(keys[0], keys[1], input_dims, fc1_dims)
    w2, b2 = linear(keys[2], keys[3], fc1_dims, fc2_dims)
    w3, b3 = linear(keys[4], keys[5], fc2_dims, n_actions)
    return w1, b1, w2, b2, w3, b3


def reference_forward(state, w1, b1, w2, b2, w3, b3):
    h1 = jnp.maximum(state @ w1 + b1, 0.0)
    h2 = jnp.maximum(h1 @ w2 + b2, 0.0)
    logits = h2 @ w3 + b3
    return jax.nn.softmax(logits, axis=1)


if __name__ == "__main__":
    # Small shapes implied by the module: (batch, input_dims) local observations.
    B, input_dims, fc1_dims, fc2_dims, n_actions = 64, 32, 64, 64, 16

    key = jax.random.PRNGKey(0)
    k_params, k_state = jax.random.split(key)

    raw_params = init_actor_params(k_params, input_dims, fc1_dims, fc2_dims,
                                   n_actions)
    # One-time lane-padding prep (kept as persistent params, not per-call work).
    params = prepare_actor_params(*raw_params)
    params = tuple(jax.block_until_ready(p) for p in params)

    state = jax.random.normal(k_state, (B, input_dims), jnp.float32)

    # Main check: single grid step, lane-dense (B, 128) output block.
    pi = jax.block_until_ready(actor_forward(state, *params, n_actions=n_actions))
    ref = reference_forward(state, *raw_params)
    assert pi.shape == (B, n_actions)
    assert jnp.allclose(pi, ref, atol=2e-3, rtol=2e-2), float(
        jnp.max(jnp.abs(pi - ref)))
    assert jnp.allclose(jnp.sum(pi, axis=1), 1.0, atol=1e-3)

    # Ragged / odd batch: full-array block, no wrapper-side batch pad or slice.
    B2 = 37
    state2 = state[:B2]
    pi2 = jax.block_until_ready(actor_forward(state2, *params,
                                              n_actions=n_actions))
    ref2 = reference_forward(state2, *raw_params)
    assert pi2.shape == (B2, n_actions)
    assert jnp.allclose(pi2, ref2, atol=2e-3, rtol=2e-2), float(
        jnp.max(jnp.abs(pi2 - ref2)))
    assert jnp.allclose(jnp.sum(pi2, axis=1), 1.0, atol=1e-3)

    print("KERNEL_OK")
</pallas_src>

<mosaic_0001>
module attributes {stable_mosaic.version = 11 : i64} {
  func.func @_actor_kernel(%arg0: i32, %arg1: memref<64x32xf32, #tpu.memory_space<vmem>>, %arg2: memref<32x128xf32, #tpu.memory_space<vmem>>, %arg3: memref<1x128xf32, #tpu.memory_space<vmem>>, %arg4: memref<128x128xf32, #tpu.memory_space<vmem>>, %arg5: memref<1x128xf32, #tpu.memory_space<vmem>>, %arg6: memref<128x128xf32, #tpu.memory_space<vmem>>, %arg7: memref<1x128xf32, #tpu.memory_space<vmem>>, %arg8: memref<64x128xf32, #tpu.memory_space<vmem>>) attributes {dimension_semantics = [#tpu.dimension_semantics<arbitrary>], iteration_bounds = array<i64: 1>, scalar_prefetch = 0 : i64, scratch_operands = 0 : i64, tpu.core_type = #tpu.core_type<tc>, window_params = [{transform_indices = @transform_0, window_bounds = array<i64: 64, 32>}, {pipeline_mode = #tpu.pipeline_mode<synchronous>, transform_indices = @transform_1, window_bounds = array<i64: 32, 128>}, {pipeline_mode = #tpu.pipeline_mode<synchronous>, transform_indices = @transform_2, window_bounds = array<i64: 1, 128>}, {pipeline_mode = #tpu.pipeline_mode<synchronous>, transform_indices = @transform_3, window_bounds = array<i64: 128, 128>}, {pipeline_mode = #tpu.pipeline_mode<synchronous>, transform_indices = @transform_4, window_bounds = array<i64: 1, 128>}, {pipeline_mode = #tpu.pipeline_mode<synchronous>, transform_indices = @transform_5, window_bounds = array<i64: 128, 128>}, {pipeline_mode = #tpu.pipeline_mode<synchronous>, transform_indices = @transform_6, window_bounds = array<i64: 1, 128>}, {transform_indices = @transform_7, window_bounds = array<i64: 64, 128>}]} {
    %c0 = arith.constant 0 : index
    %c0_0 = arith.constant 0 : index
    %0 = vector.load %arg1[%c0, %c0_0] : memref<64x32xf32, #tpu.memory_space<vmem>>, vector<64x32xf32>
    %c0_1 = arith.constant 0 : index
    %c0_2 = arith.constant 0 : index
    %1 = vector.load %arg2[%c0_1, %c0_2] : memref<32x128xf32, #tpu.memory_space<vmem>>, vector<32x128xf32>
    %cst = arith.constant dense<0.000000e+00> : vector<64x128xf32>
    %2 = tpu.matmul %0, %1, %cst {dimension_numbers = #tpu.dot_dimension_numbers<[1], [0], [0], [1], [0, 0, 1, 1], [], []>} : vector<64x32xf32>, vector<32x128xf32>, vector<64x128xf32> -> vector<64x128xf32>
    %c0_3 = arith.constant 0 : index
    %c0_4 = arith.constant 0 : index
    %3 = vector.load %arg3[%c0_3, %c0_4] : memref<1x128xf32, #tpu.memory_space<vmem>>, vector<1x128xf32>
    %4 = vector.broadcast %3 : vector<1x128xf32> to vector<64x128xf32>
    %5 = arith.addf %2, %4 : vector<64x128xf32>
    %cst_5 = arith.constant 0.000000e+00 : f32
    %6 = vector.broadcast %cst_5 : f32 to vector<64x128xf32>
    %7 = arith.maximumf %5, %6 : vector<64x128xf32>
    %c0_6 = arith.constant 0 : index
    %c0_7 = arith.constant 0 : index
    %8 = vector.load %arg4[%c0_6, %c0_7] : memref<128x128xf32, #tpu.memory_space<vmem>>, vector<128x128xf32>
    %cst_8 = arith.constant dense<0.000000e+00> : vector<64x128xf32>
    %9 = tpu.matmul %7, %8, %cst_8 {dimension_numbers = #tpu.dot_dimension_numbers<[1], [0], [0], [1], [0, 0, 1, 1], [], []>} : vector<64x128xf32>, vector<128x128xf32>, vector<64x128xf32> -> vector<64x128xf32>
    %c0_9 = arith.constant 0 : index
    %c0_10 = arith.constant 0 : index
    %10 = vector.load %arg5[%c0_9, %c0_10] : memref<1x128xf32, #tpu.memory_space<vmem>>, vector<1x128xf32>
    %11 = vector.broadcast %10 : vector<1x128xf32> to vector<64x128xf32>
    %12 = arith.addf %9, %11 : vector<64x128xf32>
    %cst_11 = arith.constant 0.000000e+00 : f32
    %13 = vector.broadcast %cst_11 : f32 to vector<64x128xf32>
    %14 = arith.maximumf %12, %13 : vector<64x128xf32>
    %c0_12 = arith.constant 0 : index
    %c0_13 = arith.constant 0 : index
    %15 = vector.load %arg6[%c0_12, %c0_13] : memref<128x128xf32, #tpu.memory_space<vmem>>, vector<128x128xf32>
    %cst_14 = arith.constant dense<0.000000e+00> : vector<64x128xf32>
    %16 = tpu.matmul %14, %15, %cst_14 {dimension_numbers = #tpu.dot_dimension_numbers<[1], [0], [0], [1], [0, 0, 1, 1], [], []>} : vector<64x128xf32>, vector<128x128xf32>, vector<64x128xf32> -> vector<64x128xf32>
    %c0_15 = arith.constant 0 : index
    %c0_16 = arith.constant 0 : index
    %17 = vector.load %arg7[%c0_15, %c0_16] : memref<1x128xf32, #tpu.memory_space<vmem>>, vector<1x128xf32>
    %18 = vector.broadcast %17 : vector<1x128xf32> to vector<64x128xf32>
    %19 = arith.addf %16, %18 : vector<64x128xf32>
    %cst_17 = arith.constant dense<0xFF800000> : vector<64xf32>
    %20 = vector.multi_reduction <maximumf>, %19, %cst_17 [1] : vector<64x128xf32> to vector<64xf32>
    %21 = vector.shape_cast %20 : vector<64xf32> to vector<64x1xf32>
    %22 = vector.broadcast %21 : vector<64x1xf32> to vector<64x128xf32>
    %23 = arith.subf %19, %22 : vector<64x128xf32>
    %24 = math.exp %23 : vector<64x128xf32>
    %cst_18 = arith.constant dense<0.000000e+00> : vector<64xf32>
    %25 = vector.multi_reduction <add>, %24, %cst_18 [1] : vector<64x128xf32> to vector<64xf32>
    %26 = vector.shape_cast %25 : vector<64xf32> to vector<64x1xf32>
    %27 = vector.broadcast %26 : vector<64x1xf32> to vector<64x128xf32>
    %28 = arith.divf %24, %27 : vector<64x128xf32>
    %c0_19 = arith.constant 0 : index
    %c0_20 = arith.constant 0 : index
    %29 = vector.load %arg8[%c0_19, %c0_20] : memref<64x128xf32, #tpu.memory_space<vmem>>, vector<64x128xf32>
    tpu.vector_store %arg8[%c0_19, %c0_20], %28 {strides = array<i32>} : memref<64x128xf32, #tpu.memory_space<vmem>>, vector<64x128xf32>,
    return
  }
  func.func @transform_0(%arg0: i32) -> (i32, i32) {
    %c0_i32 = arith.constant 0 : i32
    %c0_i32_0 = arith.constant 0 : i32
    return %arg0, %c0_i32 : i32, i32
  }
  func.func @transform_1(%arg0: i32) -> (i32, i32) {
    %c0_i32 = arith.constant 0 : i32
    %c0_i32_0 = arith.constant 0 : i32
    %c0_i32_1 = arith.constant 0 : i32
    return %c0_i32, %c0_i32_0 : i32, i32
  }
  func.func @transform_2(%arg0: i32) -> (i32, i32) {
    %c0_i32 = arith.constant 0 : i32
    %c0_i32_0 = arith.constant 0 : i32
    %c0_i32_1 = arith.constant 0 : i32
    return %c0_i32, %c0_i32_0 : i32, i32
  }
  func.func @transform_3(%arg0: i32) -> (i32, i32) {
    %c0_i32 = arith.constant 0 : i32
    %c0_i32_0 = arith.constant 0 : i32
    %c0_i32_1 = arith.constant 0 : i32
    return %c0_i32, %c0_i32_0 : i32, i32
  }
  func.func @transform_4(%arg0: i32) -> (i32, i32) {
    %c0_i32 = arith.constant 0 : i32
    %c0_i32_0 = arith.constant 0 : i32
    %c0_i32_1 = arith.constant 0 : i32
    return %c0_i32, %c0_i32_0 : i32, i32
  }
  func.func @transform_5(%arg0: i32) -> (i32, i32) {
    %c0_i32 = arith.constant 0 : i32
    %c0_i32_0 = arith.constant 0 : i32
    %c0_i32_1 = arith.constant 0 : i32
    return %c0_i32, %c0_i32_0 : i32, i32
  }
  func.func @transform_6(%arg0: i32) -> (i32, i32) {
    %c0_i32 = arith.constant 0 : i32
    %c0_i32_0 = arith.constant 0 : i32
    %c0_i32_1 = arith.constant 0 : i32
    return %c0_i32, %c0_i32_0 : i32, i32
  }
  func.func @transform_7(%arg0: i32) -> (i32, i32) {
    %c0_i32 = arith.constant 0 : i32
    %c0_i32_0 = arith.constant 0 : i32
    return %arg0, %c0_i32 : i32, i32
  }
}

</mosaic_0001>

<bundles_post_ra>
// kernel: actor_forward.1
= control target key start
LH: loop header
LB: loop body
LE: loop exit
PB: predicated region body
PF: predicated region fallthrough
CT: control target
= control target key end

     0   :  { %12 = vsyncpa [#allocation3], 0  ;;  %s1041_s0 = inlined_call_operand.vmem [shape: f32[64,32], index: 0, kind: input, shape index: {}]   ;;  %s1042_s1 = inlined_call_operand.vmem [shape: f32[32,128], index: 1, kind: input, shape index: {}]   ;;  %s1043_s2 = inlined_call_operand.vmem [shape: f32[1,128], index: 2, kind: input, shape index: {}]   ;;  %s1044_s3 = inlined_call_operand.hbm [shape: f32[128,128], index: 3, kind: input, shape index: {}]   ;;  %s1045_s4 = inlined_call_operand.vmem [shape: f32[1,128], index: 4, kind: input, shape index: {}]   ;;  %s1046_s5 = inlined_call_operand.hbm [shape: f32[128,128], index: 5, kind: input, shape index: {}]   ;;  %s1047_s6 = inlined_call_operand.vmem [shape: f32[1,128], index: 6, kind: input, shape index: {}]   ;;  %s1048_s7 = inlined_call_operand.vmem [shape: f32[64,128], index: 7, kind: output, shape index: {}]  }
   0x1   :  { %13 = vsyncpa [#allocation5], 0  ;;  %s896_s24 = smov [#allocation2]   ;;  %s848_s28 = scalar_lea.hbm %s1044_s3, 2048 }
   0x2   :  { %s25_s25 = sshll.u32 %s896_s24, 4  ;;  %p849_p0 = scmp.ne.s32.totalorder %s1044_s3, %s848_s28  ;;  %s26_s25 = int_to_ptr.vmem [resolvable:$true] %s25_s25 }
   0x3   :  { %p852_p1 = scmp.lt.u32.totalorder %s848_s28, %s1044_s3 }
   0x5   :  { %p854_p2 = pnand %p852_p1, %p849_p0 }
   0x7   :  { %857 = shalt.err (!%p854_p2)
}
   0x8   :  { %s858_s10 = scalar_lea.vmem %s26_s25, 2048  ;;  %p863_p4 = scmp.lt.s32.totalorder %s26_s25, %s26_s25 }
   0x9   :  { %p859_p3 = scmp.ne.s32.totalorder %s26_s25, %s858_s10  ;;  %p864_p5 = scmp.lt.s32.totalorder %s858_s10, %s858_s10 }
   0xb   :  { %p865_p6 = por %p864_p5, %p863_p4 }
   0xd   :  { %p866_p7 = pnand %p865_p6, %p859_p3 }
   0xf   :  { %869 = shalt.err (!%p866_p7)
}
  0x10   :  { %s897_s11 = smov 128   ;;  %s898_s12 = smov 8  }
  0x11   :  { %31 = dma.hbm_to_vmem [thread:$0]  %s1044_s3, 2048, %s26_s25, [#allocation3], %s897_s11, %s897_s11, %s898_s12  }
  0x12   :  { %s899_s15 = smov [#allocation4]   ;;  %s870_s19 = scalar_lea.hbm %s1046_s5, 2048 }
  0x13   :  { %s39_s16 = sshll.u32 %s899_s15, 4  ;;  %p871_p8 = scmp.ne.s32.totalorder %s1046_s5, %s870_s19  ;;  %s40_s16 = int_to_ptr.vmem [resolvable:$true] %s39_s16 }
  0x14   :  { %p874_p9 = scmp.lt.u32.totalorder %s870_s19, %s1046_s5 }
  0x16   :  { %p876_p10 = pnand %p874_p9, %p871_p8 }
  0x18   :  { %879 = shalt.err (!%p876_p10)
}
  0x19   :  { %s880_s24 = scalar_lea.vmem %s40_s16, 2048  ;;  %p885_p12 = scmp.lt.s32.totalorder %s40_s16, %s40_s16 }
  0x1a   :  { %p881_p11 = scmp.ne.s32.totalorder %s40_s16, %s880_s24  ;;  %p886_p13 = scmp.lt.s32.totalorder %s880_s24, %s880_s24 }
  0x1c   :  { %p887_p0 = por %p886_p13, %p885_p12 }
  0x1e   :  { %p888_p1 = pnand %p887_p0, %p881_p11 }
  0x20   :  { %891 = shalt.err (!%p888_p1)
}
  0x21   :  { %45 = dma.hbm_to_vmem [thread:$0]  %s1046_s5, 2048, %s40_s16, [#allocation5], %s897_s11, %s897_s11, %s898_s12  }
  0x22   :  { %892 = dma.done.wait [#allocation3], 2048  }
  0x23   :  { %893 = vsyncadd [#allocation3], 4294965248 }
  0x24   :  { %894 = dma.done.wait [#allocation5], 2048  }
  0x25   :  { %895 = vsyncadd [#allocation5], 4294965248  ;;  %vm73_vm0 = vcmask 261120   ;;  %v62_v0 = vld [vmem:[%s1042_s1] sm:$0xff]  ;;  %v63_v1 = vld [vmem:[%s1042_s1 + $0x8] sm:$0xff] }
  0x26   :  { %v64_v2 = vld [vmem:[%s1042_s1 + $0x10] sm:$0xff]  ;;  %v740_v3 = vpack.c.bf16 %v63_v1, %v62_v0  ;;  %v65_v4 = vld [vmem:[%s1042_s1 + $0x18] sm:$0xff]  ;;  %v54_v5 = vld [vmem:[%s1041_s0] sm:$0xff] }
  0x27   :  { %v744_v6 = vpack.c.bf16 %v65_v4, %v64_v2  ;;  %640 = vmatprep.mubr.msk.f32.mxu0 %vm73_vm0, %v54_v5  ;;  %v211_v7 = vld [vmem:[#allocation2] sm:$0xff]  ;;  %v212_v8 = vld [vmem:[#allocation2 + $0x8] sm:$0xff]  ;;  %v213_v9 = vld [vmem:[#allocation2 + $0x10] sm:$0xff] }
  0x28   :  { %741 = vmatprep.subr.bf16.mxu0 %v740_v3  ;;  %v748_v10 = vpack.c.bf16 %v212_v8, %v211_v7  ;;  %v214_v11 = vld [vmem:[#allocation2 + $0x18] sm:$0xff]  ;;  %v215_v13 = vld [vmem:[#allocation2 + $0x20] sm:$0xff]  ;;  %v216_v14 = vld [vmem:[#allocation2 + $0x28] sm:$0xff] }
  0x29   :  { %743 = vmatpush3.bf16.msra.mxu0 %v740_v3  ;;  %v752_v12 = vpack.c.bf16 %v214_v11, %v213_v9  ;;  %v55_v15 = vld [vmem:[%s1041_s0 + $0x8] sm:$0xff]  ;;  %v56_v16 = vld [vmem:[%s1041_s0 + $0x10] sm:$0xff]  ;;  %v756_v17 = vpack.c.bf16 %v216_v14, %v215_v13  ;;  %v218_v19 = vld [vmem:[#allocation2 + $0x38] sm:$0xff] }
  0x2a   :  { %745 = vmatprep.subr.bf16.mxu0 %v744_v6  ;;  %749 = vmatprep.subr.bf16.mxu1 %v748_v10  ;;  %v217_v18 = vld [vmem:[#allocation2 + $0x30] sm:$0xff]  ;;  %v57_v20 = vld [vmem:[%s1041_s0 + $0x18] sm:$0xff]  ;;  %v58_v21 = vld [vmem:[%s1041_s0 + $0x20] sm:$0xff] }
  0x2b   :  { %751 = vmatpush3.bf16.msra.mxu1 %v748_v10  ;;  %v760_v22 = vpack.c.bf16 %v218_v19, %v217_v18  ;;  %v219_v23 = vld [vmem:[#allocation2 + $0x40] sm:$0xff]  ;;  %v220_v24 = vld [vmem:[#allocation2 + $0x48] sm:$0xff]  ;;  %v60_v26 = vld [vmem:[%s1041_s0 + $0x30] sm:$0xff] }
  0x2c   :  { %753 = vmatprep.subr.bf16.mxu1 %v752_v12  ;;  %v59_v25 = vld [vmem:[%s1041_s0 + $0x28] sm:$0xff]  ;;  %v764_v27 = vpack.c.bf16 %v220_v24, %v219_v23  ;;  %v221_v28 = vld [vmem:[#allocation2 + $0x50] sm:$0xff]  ;;  %v222_v29 = vld [vmem:[#allocation2 + $0x58] sm:$0xff] }
  0x2d   :  { %747 = vmatpush3.bf16.msra.mxu0 %v744_v6  ;;  %v61_v30 = vld [vmem:[%s1041_s0 + $0x38] sm:$0xff]  ;;  %v768_v31 = vpack.c.bf16 %v222_v29, %v221_v28  ;;  %v223_v32 = vld [vmem:[#allocation2 + $0x60] sm:$0xff]  ;;  %v224_v33 = vld [vmem:[#allocation2 + $0x68] sm:$0xff] }
  0x2e   :  { %v772_v34 = vpack.c.bf16 %v224_v33, %v223_v32  ;;  %v225_v35 = vld [vmem:[#allocation2 + $0x70] sm:$0xff]  ;;  %v226_v36 = vld [vmem:[#allocation2 + $0x78] sm:$0xff]  ;;  %v347_v38 = vld [vmem:[#allocation4] sm:$0xff] }
  0x2f   :  { %755 = vmatpush3.bf16.msra.mxu1 %v752_v12  ;;  %v776_v37 = vpack.c.bf16 %v226_v36, %v225_v35  ;;  %v348_v39 = vld [vmem:[#allocation4 + $0x8] sm:$0xff]  ;;  %v349_v40 = vld [vmem:[#allocation4 + $0x10] sm:$0xff]  ;;  %v350_v42 = vld [vmem:[#allocation4 + $0x18] sm:$0xff] }
  0x30   :  { %641 = vmatmul.mubr.msk.f32.vlgmr.msra.gmra.mrb[0].mxu0 %vm73_vm0, %v55_v15  ;;  %757 = vmatprep.subr.bf16.mxu1 %v756_v17  ;;  %v780_v41 = vpack.c.bf16 %v348_v39, %v347_v38  ;;  %v784_v43 = vpack.c.bf16 %v350_v42, %v349_v40  ;;  %v351_v44 = vld [vmem:[#allocation4 + $0x20] sm:$0xff]  ;;  %v352_v45 = vld [vmem:[#allocation4 + $0x28] sm:$0xff]  ;;  %v353_v47 = vld [vmem:[#allocation4 + $0x30] sm:$0xff] }
  0x31   :  { %643 = vmatprep.mubr.msk.f32.mxu0 %vm73_vm0, %v56_v16  ;;  %v788_v46 = vpack.c.bf16 %v352_v45, %v351_v44  ;;  %v354_v48 = vld [vmem:[#allocation4 + $0x38] sm:$0xff]  ;;  %v355_v50 = vld [vmem:[#allocation4 + $0x40] sm:$0xff]  ;;  %v356_v51 = vld [vmem:[#allocation4 + $0x48] sm:$0xff] }
  0x32   :  { %781 = vmatprep.subr.bf16.mxu0 %v780_v41  ;;  %v792_v49 = vpack.c.bf16 %v354_v48, %v353_v47  ;;  %v796_v52 = vpack.c.bf16 %v356_v51, %v355_v50  ;;  %v357_v53 = vld [vmem:[#allocation4 + $0x50] sm:$0xff]  ;;  %v358_v54 = vld [vmem:[#allocation4 + $0x58] sm:$0xff]  ;;  %v359_v56 = vld [vmem:[#allocation4 + $0x60] sm:$0xff] }
  0x33   :  { %759 = vmatpush3.bf16.msra.mxu1 %v756_v17  ;;  %783 = vmatpush3.bf16.msra.mxu0 %v780_v41  ;;  %v800_v55 = vpack.c.bf16 %v358_v54, %v357_v53  ;;  %v360_v57 = vld [vmem:[#allocation4 + $0x68] sm:$0xff]  ;;  %v561_v59 = vld [vmem:[%s1043_s2] ss:$0 sm:$0xff] }
  0x34   :  { %644 = vmatmul.mubr.msk.f32.gmra.mrb[2].mxu0 %vm73_vm0, %v57_v20  ;;  %761 = vmatprep.subr.bf16.mxu1 %v760_v22  ;;  %v804_v58 = vpack.c.bf16 %v360_v57, %v359_v56  ;;  %v361_v20 = vld [vmem:[#allocation4 + $0x70] sm:$0xff]  ;;  %v570_v23 = vld [vmem:[%s1045_s4] ss:$0 sm:$0xff] }
  0x35   :  { %646 = vmatprep.mubr.msk.f32.mxu0 %vm73_vm0, %v58_v21  ;;  %785 = vmatprep.subr.bf16.mxu0 %v784_v43  ;;  %v362_v21 = vld [vmem:[#allocation4 + $0x78] sm:$0xff]  ;;  %v571_v48 = vld [vmem:[%s1047_s6] ss:$0 sm:$0xff] }
  0x37   :  { %763 = vmatpush3.bf16.msra.mxu1 %v760_v22  ;;  %787 = vmatpush3.bf16.msra.mxu0 %v784_v43  ;;  %v808_v22 = vpack.c.bf16 %v362_v21, %v361_v20 }
  0x38   :  { %647 = vmatmul.mubr.msk.f32.gmra.mrb[4].mxu0 %vm73_vm0, %v59_v25  ;;  %765 = vmatprep.subr.bf16.mxu1 %v764_v27 }
  0x39   :  { %649 = vmatprep.mubr.msk.f32.mxu0 %vm73_vm0, %v60_v26  ;;  %789 = vmatprep.subr.bf16.mxu0 %v788_v46 }
  0x3b   :  { %767 = vmatpush3.bf16.msra.mxu1 %v764_v27  ;;  %791 = vmatpush3.bf16.msra.mxu0 %v788_v46 }
  0x3c   :  { %650 = vmatmul.mubr.msk.f32.gmra.mrb[6].mxu0 %vm73_vm0, %v61_v30  ;;  %769 = vmatprep.subr.bf16.mxu1 %v768_v31 }
  0x3d   :  { %793 = vmatprep.subr.bf16.mxu0 %v792_v49 }
  0x3f   :  { %771 = vmatpush3.bf16.msra.mxu1 %v768_v31  ;;  %795 = vmatpush3.bf16.msra.mxu0 %v792_v49 }
  0x40   :  { %773 = vmatprep.subr.bf16.mxu1 %v772_v34  ;;  %797 = vmatprep.subr.bf16.mxu0 %v796_v52 }
  0x43   :  { %775 = vmatpush3.bf16.msra.mxu1 %v772_v34  ;;  %799 = vmatpush3.bf16.msra.mxu0 %v796_v52 }
  0x44   :  { %777 = vmatprep.subr.bf16.mxu1 %v776_v37  ;;  %801 = vmatprep.subr.bf16.mxu0 %v800_v55 }
  0x47   :  { %779 = vmatpush3.bf16.msra.mxu1 %v776_v37  ;;  %803 = vmatpush3.bf16.msra.mxu0 %v800_v55 }
  0x48   :  { %805 = vmatprep.subr.bf16.mxu0 %v804_v58 }
  0x4b   :  { %807 = vmatpush3.bf16.msra.mxu0 %v804_v58 }
  0x4c   :  { %809 = vmatprep.subr.bf16.mxu0 %v808_v22 }
  0x4f   :  { %811 = vmatpush3.bf16.msra.mxu0 %v808_v22 }
 0x103   :  { %v642_v60 = vpop.f32.mrb[0].mxu0 }
 0x104   :  { %v170_v61 = vadd.f32 %v642_v60, %v561_v59  ;;  %v164_v62 = vpop.f32.mrb[1].mxu0 }
 0x105   :  { %v165_v63 = vadd.f32 %v561_v59, %v164_v62 }
 0x106   :  { %v204_v2 = vmax.f32 %v170_v61, 0.0 }
 0x107   :  { %v645_v0 = vpop.f32.mrb[2].mxu0  ;;  %v203_v1 = vmax.f32 %v165_v63, 0.0 }
 0x108   :  { %v180_v3 = vadd.f32 %v645_v0, %v561_v59  ;;  %v174_v4 = vpop.f32.mrb[3].mxu0 }
 0x109   :  { %v175_v5 = vadd.f32 %v561_v59, %v174_v4  ;;  %684 = vmatprep.mubr.f32.mxu1 %v203_v1 }
 0x10a   :  { %685 = vmatmul.mubr.f32.vlgmr.msra.gmra.mrb[0].mxu1 %v204_v2  ;;  %v206_v8 = vmax.f32 %v180_v3, 0.0 }
 0x10b   :  { %v205_v6 = vmax.f32 %v175_v5, 0.0  ;;  %v648_v7 = vpop.f32.mrb[4].mxu0 }
 0x10c   :  { %v190_v9 = vadd.f32 %v648_v7, %v561_v59  ;;  %v184_v10 = vpop.f32.mrb[5].mxu0 }
 0x10d   :  { %v185_v11 = vadd.f32 %v561_v59, %v184_v10  ;;  %687 = vmatprep.mubr.f32.mxu1 %v205_v6 }
 0x10e   :  { %v208_v12 = vmax.f32 %v190_v9, 0.0  ;;  %688 = vmatmul.mubr.f32.gmra.mrb[2].mxu1 %v206_v8 }
 0x10f   :  { %v207_v13 = vmax.f32 %v185_v11, 0.0  ;;  %v651_v14 = vpop.f32.mrb[6].mxu0 }
 0x110   :  { %v200_v15 = vadd.f32 %v651_v14, %v561_v59  ;;  %v194_v16 = vpop.f32.mrb[7].mxu0 }
 0x111   :  { %v195_v17 = vadd.f32 %v561_v59, %v194_v16  ;;  %690 = vmatprep.mubr.f32.mxu1 %v207_v13 }
 0x112   :  { %v210_v18 = vmax.f32 %v200_v15, 0.0  ;;  %691 = vmatmul.mubr.f32.gmra.mrb[4].mxu1 %v208_v12 }
 0x113   :  { %v209_v19 = vmax.f32 %v195_v17, 0.0 }
 0x115   :  { %693 = vmatprep.mubr.f32.mxu1 %v209_v19 }
 0x116   :  { %694 = vmatmul.mubr.f32.gmra.mrb[6].mxu1 %v210_v18 }
 0x1dd   :  { %v686_v24 = vpop.f32.mrb[0].mxu1 }
 0x1de   :  { %v306_v25 = vadd.f32 %v686_v24, %v570_v23  ;;  %v300_v26 = vpop.f32.mrb[1].mxu1 }
 0x1df   :  { %v301_v27 = vadd.f32 %v570_v23, %v300_v26 }
 0x1e0   :  { %v340_v30 = vmax.f32 %v306_v25, 0.0 }
 0x1e1   :  { %v339_v28 = vmax.f32 %v301_v27, 0.0  ;;  %v689_v29 = vpop.f32.mrb[2].mxu1 }
 0x1e2   :  { %v316_v31 = vadd.f32 %v689_v29, %v570_v23  ;;  %v310_v32 = vpop.f32.mrb[3].mxu1 }
 0x1e3   :  { %v311_v33 = vadd.f32 %v570_v23, %v310_v32  ;;  %728 = vmatprep.mubr.f32.mxu0 %v339_v28 }
 0x1e4   :  { %729 = vmatmul.mubr.f32.vlgmr.msra.gmra.mrb[8].mxu0 %v340_v30  ;;  %v342_v36 = vmax.f32 %v316_v31, 0.0 }
 0x1e5   :  { %v341_v34 = vmax.f32 %v311_v33, 0.0  ;;  %v692_v35 = vpop.f32.mrb[4].mxu1 }
 0x1e6   :  { %v326_v37 = vadd.f32 %v692_v35, %v570_v23  ;;  %v320_v38 = vpop.f32.mrb[5].mxu1 }
 0x1e7   :  { %v321_v39 = vadd.f32 %v570_v23, %v320_v38  ;;  %731 = vmatprep.mubr.f32.mxu0 %v341_v34 }
 0x1e8   :  { %v344_v40 = vmax.f32 %v326_v37, 0.0  ;;  %732 = vmatmul.mubr.f32.gmra.mrb[10].mxu0 %v342_v36 }
 0x1e9   :  { %v343_v41 = vmax.f32 %v321_v39, 0.0  ;;  %v695_v42 = vpop.f32.mrb[6].mxu1 }
 0x1ea   :  { %v336_v43 = vadd.f32 %v695_v42, %v570_v23  ;;  %v330_v44 = vpop.f32.mrb[7].mxu1 }
 0x1eb   :  { %v331_v45 = vadd.f32 %v570_v23, %v330_v44  ;;  %734 = vmatprep.mubr.f32.mxu0 %v343_v41 }
 0x1ec   :  { %v346_v46 = vmax.f32 %v336_v43, 0.0  ;;  %735 = vmatmul.mubr.f32.gmra.mrb[12].mxu0 %v344_v40 }
 0x1ed   :  { %v345_v47 = vmax.f32 %v331_v45, 0.0 }
 0x1ef   :  { %737 = vmatprep.mubr.f32.mxu0 %v345_v47 }
 0x1f0   :  { %738 = vmatmul.mubr.f32.gmra.mrb[14].mxu0 %v346_v46 }
 0x2b7   :  { %v730_v49 = vpop.f32.mrb[8].mxu0 }
 0x2b8   :  { %v442_v50 = vadd.f32 %v730_v49, %v571_v48  ;;  %v436_v51 = vpop.f32.mrb[9].mxu0 }
 0x2b9   :  { %v437_v53 = vadd.f32 %v571_v48, %v436_v51 }
 0x2ba   :  { %477 = vmax.xlane.f32.xlu0 %v442_v50 }
 0x2bb   :  { %v733_v52 = vpop.f32.mrb[10].mxu0 }
 0x2bc   :  { %v452_v54 = vadd.f32 %v733_v52, %v571_v48  ;;  %v446_v55 = vpop.f32.mrb[11].mxu0 }
 0x2bd   :  { %v447_v57 = vadd.f32 %v571_v48, %v446_v55 }
 0x2be   :  { %481 = vmax.xlane.f32.xlu1 %v452_v54  ;;  %475 = vmax.xlane.f32.xlu0 %v437_v53 }
 0x2bf   :  { %v736_v56 = vpop.f32.mrb[12].mxu0 }
 0x2c0   :  { %v456_v58 = vpop.f32.mrb[13].mxu0  ;;  %v462_v61 = vadd.f32 %v736_v56, %v571_v48 }
 0x2c1   :  { %v457_v59 = vadd.f32 %v571_v48, %v456_v58 }
 0x2c2   :  { %479 = vmax.xlane.f32.xlu1 %v447_v57 }
 0x2c3   :  { %v739_v60 = vpop.f32.mrb[14].mxu0  ;;  %483 = vmax.xlane.f32.xlu0 %v457_v59 }
 0x2c4   :  { %v466_v62 = vpop.f32.mrb[15].mxu0  ;;  %v472_v0 = vadd.f32 %v739_v60, %v571_v48 }
 0x2c5   :  { %v467_v63 = vadd.f32 %v571_v48, %v466_v62 }
 0x2c6   :  { %485 = vmax.xlane.f32.xlu1 %v462_v61 }
 0x2c7   :  { %487 = vmax.xlane.f32.xlu0 %v467_v63 }
 0x2ca   :  { %489 = vmax.xlane.f32.xlu1 %v472_v0 }
 0x347   :  { %v478_v1 = vpop.xlane.xlu0 %477 }
 0x348   :  { %v492_v2 = vsub.f32 %v442_v50, %v478_v1 }
 0x34a   :  { %v501_v3 = vmul.f32 1.442695, %v492_v2 }
 0x34b   :  { %v482_v4 = vpop.xlane.xlu1 %481  ;;  %v476_v5 = vpop.xlane.xlu0 %475 }
 0x34c   :  { %816 = vpow2.f32 %v501_v3  ;;  %v494_v6 = vsub.f32 %v452_v54, %v482_v4  ;;  %v491_v7 = vsub.f32 %v437_v53, %v476_v5 }
 0x34e   :  { %v505_v8 = vmul.f32 1.442695, %v494_v6  ;;  %v499_v9 = vmul.f32 1.442695, %v491_v7 }
 0x34f   :  { %v480_v10 = vpop.xlane.xlu1 %479 }
 0x350   :  { %818 = vpow2.f32 %v505_v8  ;;  %v493_v11 = vsub.f32 %v447_v57, %v480_v10  ;;  %v484_v12 = vpop.xlane.xlu0 %483 }
 0x351   :  { %820 = vpow2.f32 %v499_v9  ;;  %v495_v13 = vsub.f32 %v457_v59, %v484_v12 }
 0x352   :  { %v503_v14 = vmul.f32 1.442695, %v493_v11 }
 0x353   :  { %v486_v15 = vpop.xlane.xlu1 %485  ;;  %v507_v18 = vmul.f32 1.442695, %v495_v13 }
 0x354   :  { %822 = vpow2.f32 %v503_v14  ;;  %v496_v16 = vsub.f32 %v462_v61, %v486_v15  ;;  %v488_v17 = vpop.xlane.xlu0 %487 }
 0x355   :  { %v497_v19 = vsub.f32 %v467_v63, %v488_v17 }
 0x356   :  { %v817_v20 = vpop.eup %816  ;;  %v509_v21 = vmul.f32 1.442695, %v496_v16 }
 0x357   :  { %517 = vadd.xlane.f32.xlu1 %v817_v20  ;;  %v490_v22 = vpop.xlane.xlu1 %489  ;;  %v511_v24 = vmul.f32 1.442695, %v497_v19 }
 0x358   :  { %824 = vpow2.f32 %v509_v21  ;;  %v498_v23 = vsub.f32 %v472_v0, %v490_v22 }
 0x359   :  { %826 = vpow2.f32 %v507_v18 }
 0x35a   :  { %v819_v25 = vpop.eup %818  ;;  %v513_v26 = vmul.f32 1.442695, %v498_v23 }
 0x35b   :  { %v821_v27 = vpop.eup %820  ;;  %521 = vadd.xlane.f32.xlu1 %v819_v25 }
 0x35c   :  { %828 = vpow2.f32 %v513_v26  ;;  %515 = vadd.xlane.f32.xlu0 %v821_v27 }
 0x35d   :  { %830 = vpow2.f32 %v511_v24 }
 0x35e   :  { %v823_v28 = vpop.eup %822 }
 0x360   :  { %519 = vadd.xlane.f32.xlu0 %v823_v28 }
 0x362   :  { %v825_v29 = vpop.eup %824 }
 0x363   :  { %v827_v30 = vpop.eup %826  ;;  %525 = vadd.xlane.f32.xlu1 %v825_v29 }
 0x364   :  { %523 = vadd.xlane.f32.xlu0 %v827_v30 }
 0x366   :  { %v829_v31 = vpop.eup %828 }
 0x367   :  { %v831_v32 = vpop.eup %830  ;;  %529 = vadd.xlane.f32.xlu1 %v829_v31 }
 0x368   :  { %527 = vadd.xlane.f32.xlu0 %v831_v32 }
 0x3e4   :  { %v518_v33 = vpop.xlane.xlu1 %517 }
 0x3e5   :  { %832 = vrcp.f32 %v518_v33 }
 0x3e8   :  { %v522_v34 = vpop.xlane.xlu1 %521 }
 0x3e9   :  { %834 = vrcp.f32 %v522_v34  ;;  %v516_v35 = vpop.xlane.xlu0 %515 }
 0x3ea   :  { %836 = vrcp.f32 %v516_v35 }
 0x3ed   :  { %v520_v36 = vpop.xlane.xlu0 %519 }
 0x3ee   :  { %838 = vrcp.f32 %v520_v36 }
 0x3ef   :  { %v833_v37 = vpop.eup %832 }
 0x3f0   :  { %v534_v38 = vmul.f32 %v833_v37, %v817_v20  ;;  %v526_v39 = vpop.xlane.xlu1 %525 }
 0x3f1   :  { %840 = vrcp.f32 %v526_v39  ;;  %v524_v40 = vpop.xlane.xlu0 %523 }
 0x3f2   :  { %548 = vst [vmem:[%s1048_s7 + $0x8] sm:$0xff] %v534_v38  ;;  %842 = vrcp.f32 %v524_v40 }
 0x3f3   :  { %v835_v41 = vpop.eup %834 }
 0x3f4   :  { %v837_v42 = vpop.eup %836  ;;  %v538_v43 = vmul.f32 %v835_v41, %v819_v25  ;;  %v530_v44 = vpop.xlane.xlu1 %529 }
 0x3f5   :  { %v532_v45 = vmul.f32 %v837_v42, %v821_v27  ;;  %844 = vrcp.f32 %v530_v44  ;;  %v528_v46 = vpop.xlane.xlu0 %527 }
 0x3f6   :  { %550 = vst [vmem:[%s1048_s7 + $0x18] sm:$0xff] %v538_v43  ;;  %846 = vrcp.f32 %v528_v46 }
 0x3f7   :  { %547 = vst [vmem:[%s1048_s7] sm:$0xff] %v532_v45 }
 0x3f8   :  { %v839_v47 = vpop.eup %838 }
 0x3f9   :  { %v536_v48 = vmul.f32 %v839_v47, %v823_v28 }
 0x3fb   :  { %v841_v49 = vpop.eup %840  ;;  %549 = vst [vmem:[%s1048_s7 + $0x10] sm:$0xff] %v536_v48 }
 0x3fc   :  { %v843_v50 = vpop.eup %842  ;;  %v542_v51 = vmul.f32 %v841_v49, %v825_v29 }
 0x3fd   :  { %v540_v52 = vmul.f32 %v843_v50, %v827_v30 }
 0x3fe   :  { %552 = vst [vmem:[%s1048_s7 + $0x28] sm:$0xff] %v542_v51 }
 0x3ff   :  { %v845_v53 = vpop.eup %844  ;;  %551 = vst [vmem:[%s1048_s7 + $0x20] sm:$0xff] %v540_v52 }
 0x400   :  { %v847_v54 = vpop.eup %846  ;;  %v546_v55 = vmul.f32 %v845_v53, %v829_v31 }
 0x401   :  { %v544_v56 = vmul.f32 %v847_v54, %v831_v32 }
 0x402   :  { %554 = vst [vmem:[%s1048_s7 + $0x38] sm:$0xff] %v546_v55 }
 0x403   :  { %553 = vst [vmem:[%s1048_s7 + $0x30] sm:$0xff] %v544_v56 }
 0x404   :  { %559 = vsyncpa [#allocation3], 1 }
 0x405   :  { %560 = vsyncpa [#allocation5], 1 }

</bundles_post_ra>
